<compile_context>
chip_gen: v5e
topology: v5e:2x2
jax: 0.10.0
libtpu: 0.0.40
codegen_flags: <defaults>
</compile_context>

<pallas_src>
import jax
import jax.numpy as jnp
import numpy as np
from jax import lax
from jax.experimental import pallas as pl
from jax.experimental.pallas import tpu as pltpu

# ---------------- model config ----------------
B = 2            # batch
D = 16           # freqlen
T = 8            # seqlen
H = 32           # RNN_dims[-1] (LSTM hidden)
HID1 = 64        # hidden_units[0]
CODE = 32        # hidden_size (code_dim)
LSIZE = 2 * 1 * H  # 2 * directions * RNN_dims[-1] = 64

BP = 8           # batch padded to one full sublane group (8)
G = 4 * H        # 128 gate lanes (i | f | g | o)
DT = D * T       # 128 flattened input features per example
HP = 128         # lane-dense padded MLP hidden width


# ---------------- fused Pallas kernel ----------------
def encoder_kernel(x_ref, wexp_ref, ball_ref, whh_ref,
                   w1_ref, b1_ref, w2_ref, b2_ref, out_ref):
    """Fused LSTM recurrence + EncoderMLP in one kernel invocation.

    x_ref    : [B, D*T]      row-major flattened input (k = d*T + t)
    wexp_ref : [D*T, T*4H]   time-expanded W_ih^T (permute folded in)
    ball_ref : [1, T*4H]     (b_ih + b_hh) tiled over T
    whh_ref  : [H, 4H]       W_hh^T
    w1_ref   : [H, 128]      first MLP weight, concat folded, lane-padded
    b1_ref   : [1, 128]
    w2_ref   : [128, CODE]
    b2_ref   : [1, CODE]
    out_ref  : [B, CODE]
    """
    # --- pad batch 2 -> 8 sublanes in-kernel (broadcast + select, no matmul,
    #     no extra XLA dispatch in the wrapper). Padded rows see zero input. ---
    x2 = x_ref[...]                                              # [B, DT]
    row = lax.broadcasted_iota(jnp.int32, (BP, 1), 0)            # [BP, 1]
    x_pad = jnp.zeros((BP, DT), jnp.float32)
    for b in range(B):  # B is tiny & static
        x_pad = x_pad + jnp.where(row == b, x2[b:b + 1, :], 0.0)  # [BP, DT]

    # --- hoisted, time-expanded input projection for all timesteps ---
    # gx[:, t*G:(t+1)*G] == x[:, :, t] @ W_ih^T + (b_ih + b_hh), so each
    # per-step slice is a single 128-lane-aligned vreg.
    gx = (jnp.dot(x_pad, wexp_ref[...], preferred_element_type=jnp.float32)
          + ball_ref[...])                                       # [BP, T*G]

    whh = whh_ref[...]                                           # [H, G] loop-invariant MXU RHS

    # --- one-tanh gate activations: sigmoid(x) = 0.5*tanh(x/2) + 0.5 -------
    # pre = 0.5 on i/f/o lanes, 1.0 on g lanes; off = 0.5 on i/f/o, 0.0 on g.
    lane = lax.broadcasted_iota(jnp.int32, (BP, G), 1)
    is_g = jnp.logical_and(lane >= 2 * H, lane < 3 * H)
    pre = jnp.where(is_g, 1.0, 0.5).astype(jnp.float32)          # hoisted
    off = jnp.where(is_g, 0.0, 0.5).astype(jnp.float32)          # hoisted

    h = jnp.zeros((BP, H), jnp.float32)
    c = jnp.zeros((BP, H), jnp.float32)

    for t in range(T):  # static unroll, T=8
        gates = (gx[:, t * G:(t + 1) * G]
                 + jnp.dot(h, whh, preferred_element_type=jnp.float32))  # [BP, G]
        act = pre * jnp.tanh(pre * gates) + off                  # 1 EUP tanh
        i_g = act[:, 0 * H:1 * H]
        f_g = act[:, 1 * H:2 * H]
        g_g = act[:, 2 * H:3 * H]
        o_g = act[:, 3 * H:4 * H]
        c = f_g * c + i_g * g_g
        h = o_g * jnp.tanh(c)                                    # 2nd EUP tanh

    # EncoderMLP: Linear(lsize->64) [concat folded, lane-padded to 128]
    # -> ReLU -> Linear(64->32). Zero-padded lanes stay exactly zero.
    h1 = jnp.dot(h, w1_ref[...], preferred_element_type=jnp.float32) + b1_ref[...]
    h1 = jnp.maximum(h1, 0.0)                                    # [BP, 128]
    res = jnp.dot(h1, w2_ref[...], preferred_element_type=jnp.float32) + b2_ref[...]
    out_ref[...] = res[:B, :]                                    # drop pad rows


# ---------------- wrapper ----------------
def _cost_estimate():
    flops = (2 * BP * DT * (T * G)          # hoisted input projection
             + T * 2 * BP * H * G           # recurrence matmuls
             + 2 * BP * H * HP + 2 * BP * HP * CODE)  # MLP
    transcendentals = T * (BP * G + BP * H)
    bytes_accessed = 4 * (B * DT + DT * T * G + T * G + H * G
                          + H * HP + HP + HP * CODE + CODE + B * CODE)
    return pl.CostEstimate(flops=flops, transcendentals=transcendentals,
                           bytes_accessed=bytes_accessed)


@jax.jit
def aernn_encoder_forward(x_bdt, params):
    """Full AERNNNetEncoder forward (selected_encoded_layers=-1).

    x_bdt: [B, D, T] (PyTorch layout). Returns [B, CODE].
    """
    # Free row-major reshape (no transpose, no copy): the [B,D,T]->[B,T,D]
    # permute is folded into w_exp inside the kernel.
    x_flat = x_bdt.reshape(B, D * T)
    vmem = pl.BlockSpec(memory_space=pltpu.MemorySpace.VMEM)
    return pl.pallas_call(
        encoder_kernel,
        out_shape=jax.ShapeDtypeStruct((B, CODE), jnp.float32),
        in_specs=[vmem] * 8,
        out_specs=vmem,
        cost_estimate=_cost_estimate(),
        compiler_params=pltpu.CompilerParams(vmem_limit_bytes=16 * 1024 * 1024),
    )(x_flat, params["w_exp"], params["b_all"], params["whh_t"],
      params["w1_pad"], params["b1_pad"], params["w2_pad"], params["b2"])


# ---------------- pure-JAX reference (for correctness check) ----------------
def lstm_ref(x_tbd, wih, whh, b_ih, b_hh):
    def step(carry, x_t):
        h, c = carry
        gates = x_t @ wih.T + h @ whh.T + b_ih + b_hh
        i, f, g, o = jnp.split(gates, 4, axis=1)
        i, f, o = jax.nn.sigmoid(i), jax.nn.sigmoid(f), jax.nn.sigmoid(o)
        g = jnp.tanh(g)
        c_new = f * c + i * g
        h_new = o * jnp.tanh(c_new)
        return (h_new, c_new), h_new

    h0 = jnp.zeros((B, H), jnp.float32)
    c0 = jnp.zeros((B, H), jnp.float32)
    (h_T, _), _ = lax.scan(step, (h0, c0), x_tbd)
    return h_T


def forward_ref(x_bdt, raw):
    x_tbd = jnp.transpose(x_bdt, (2, 0, 1))
    h_T = lstm_ref(x_tbd, raw["wih"], raw["whh"], raw["b_ih"], raw["b_hh"])
    hidden_in = jnp.concatenate([h_T, h_T], axis=1)      # out[:, -1] == hn here
    h1 = jnp.maximum(hidden_in @ raw["w1"].T + raw["b1"], 0.0)
    return h1 @ raw["w2"].T + raw["b2"]


# ---------------- deterministic parameter init ----------------
def init_params(key):
    ks = jax.random.split(key, 8)
    s = 1.0 / np.sqrt(H)
    wih = jax.random.uniform(ks[0], (4 * H, D), jnp.float32, -s, s)
    whh = jax.random.uniform(ks[1], (4 * H, H), jnp.float32, -s, s)
    b_ih = jax.random.uniform(ks[2], (4 * H,), jnp.float32, -s, s)
    b_hh = jax.random.uniform(ks[3], (4 * H,), jnp.float32, -s, s)
    s1 = 1.0 / np.sqrt(LSIZE)
    w1 = jax.random.uniform(ks[4], (HID1, LSIZE), jnp.float32, -s1, s1)
    b1 = jax.random.uniform(ks[5], (HID1,), jnp.float32, -s1, s1)
    s2 = 1.0 / np.sqrt(HID1)
    w2 = jax.random.uniform(ks[6], (CODE, HID1), jnp.float32, -s2, s2)
    b2 = jax.random.uniform(ks[7], (CODE,), jnp.float32, -s2, s2)

    raw = dict(wih=wih, whh=whh, b_ih=b_ih, b_hh=b_hh, w1=w1, b1=b1, w2=w2, b2=b2)

    wih_t = wih.T                                     # [D, 4H]
    # w_exp[d*T + t', t*4H + g] = wih_t[d, g] * (t' == t):
    # folds the [B,D,T] -> time-major permute of x into the hoisted projection.
    w_exp = jnp.einsum('dg,pt->dptg', wih_t,
                       jnp.eye(T, dtype=jnp.float32)).reshape(D * T, T * G)
    b_all = jnp.tile(b_ih + b_hh, T).reshape(1, T * G)            # [1, T*4H]

    w1_t = w1.T                                       # [LSIZE, HID1]
    # concat(h, h) @ w1.T  ==  h @ (w1_t[:H] + w1_t[H:])  (exact fold)
    w1_eff = w1_t[:H, :] + w1_t[H:, :]                # [H, HID1]
    w1_pad = jnp.zeros((H, HP), jnp.float32).at[:, :HID1].set(w1_eff)
    b1_pad = jnp.zeros((1, HP), jnp.float32).at[:, :HID1].set(b1)
    w2_pad = jnp.zeros((HP, CODE), jnp.float32).at[:HID1, :].set(w2.T)

    params = dict(
        w_exp=w_exp,                                  # [D*T, T*4H]
        b_all=b_all,                                  # [1, T*4H]
        whh_t=whh.T,                                  # [H, 4H]
        w1_pad=w1_pad,                                # [H, 128]
        b1_pad=b1_pad,                                # [1, 128]
        w2_pad=w2_pad,                                # [128, CODE]
        b2=b2.reshape(1, CODE),                       # [1, CODE]
    )
    return params, raw


if __name__ == "__main__":
    key = jax.random.PRNGKey(0)
    pkey, xkey = jax.random.split(key)
    params, raw = init_params(pkey)

    x = jax.random.normal(xkey, (B, D, T), jnp.float32)   # PyTorch-style [B, D, T]

    out = aernn_encoder_forward(x, params)
    out = jax.block_until_ready(out)

    ref = forward_ref(x, raw)
    np.testing.assert_allclose(np.asarray(out), np.asarray(ref), rtol=2e-4, atol=2e-4)

    assert out.shape == (B, CODE)
    print("KERNEL_OK")
</pallas_src>

<mosaic_0001>
module attributes {stable_mosaic.version = 11 : i64} {
  func.func @encoder_kernel(%arg0: memref<2x128xf32, #tpu.memory_space<vmem>>, %arg1: memref<128x1024xf32, #tpu.memory_space<vmem>>, %arg2: memref<1x1024xf32, #tpu.memory_space<vmem>>, %arg3: memref<32x128xf32, #tpu.memory_space<vmem>>, %arg4: memref<32x128xf32, #tpu.memory_space<vmem>>, %arg5: memref<1x128xf32, #tpu.memory_space<vmem>>, %arg6: memref<128x32xf32, #tpu.memory_space<vmem>>, %arg7: memref<1x32xf32, #tpu.memory_space<vmem>>, %arg8: memref<2x32xf32, #tpu.memory_space<vmem>>) attributes {dimension_semantics = [], scalar_prefetch = 0 : i64, scratch_operands = 0 : i64, tpu.core_type = #tpu.core_type<tc>} {
    %c0 = arith.constant 0 : index
    %c0_0 = arith.constant 0 : index
    %0 = vector.load %arg0[%c0, %c0_0] : memref<2x128xf32, #tpu.memory_space<vmem>>, vector<2x128xf32>
    %1 = tpu.iota {dimensions = array<i32: 0>} : vector<8x1xi32>
    %cst = arith.constant 0.000000e+00 : f32
    %2 = vector.broadcast %cst : f32 to vector<8x128xf32>
    %c0_i32 = arith.constant 0 : i32
    %3 = vector.broadcast %c0_i32 : i32 to vector<8x1xi32>
    %4 = arith.cmpi eq, %1, %3 : vector<8x1xi32>
    %5 = vector.extract_strided_slice %0 {offsets = [0, 0], sizes = [1, 128], strides = [1, 1]} : vector<2x128xf32> to vector<1x128xf32>
    %cst_1 = arith.constant 0.000000e+00 : f32
    %6 = vector.shape_cast %4 : vector<8x1xi1> to vector<8x1xi1>
    %7 = vector.broadcast %6 : vector<8x1xi1> to vector<8x128xi1>
    %8 = vector.shape_cast %5 : vector<1x128xf32> to vector<1x128xf32>
    %9 = vector.broadcast %8 : vector<1x128xf32> to vector<8x128xf32>
    %10 = vector.broadcast %cst_1 : f32 to vector<8x128xf32>
    %11 = arith.select %7, %9, %10 : vector<8x128xi1>, vector<8x128xf32>
    %12 = arith.addf %2, %11 : vector<8x128xf32>
    %c1_i32 = arith.constant 1 : i32
    %13 = vector.broadcast %c1_i32 : i32 to vector<8x1xi32>
    %14 = arith.cmpi eq, %1, %13 : vector<8x1xi32>
    %15 = vector.extract_strided_slice %0 {offsets = [1, 0], sizes = [1, 128], strides = [1, 1]} : vector<2x128xf32> to vector<1x128xf32>
    %cst_2 = arith.constant 0.000000e+00 : f32
    %16 = vector.shape_cast %14 : vector<8x1xi1> to vector<8x1xi1>
    %17 = vector.broadcast %16 : vector<8x1xi1> to vector<8x128xi1>
    %18 = vector.shape_cast %15 : vector<1x128xf32> to vector<1x128xf32>
    %19 = vector.broadcast %18 : vector<1x128xf32> to vector<8x128xf32>
    %20 = vector.broadcast %cst_2 : f32 to vector<8x128xf32>
    %21 = arith.select %17, %19, %20 : vector<8x128xi1>, vector<8x128xf32>
    %22 = arith.addf %12, %21 : vector<8x128xf32>
    %c0_3 = arith.constant 0 : index
    %c0_4 = arith.constant 0 : index
    %23 = vector.load %arg1[%c0_3, %c0_4] : memref<128x1024xf32, #tpu.memory_space<vmem>>, vector<128x1024xf32>
    %cst_5 = arith.constant dense<0.000000e+00> : vector<8x1024xf32>
    %24 = tpu.matmul %22, %23, %cst_5 {dimension_numbers = #tpu.dot_dimension_numbers<[1], [0], [0], [1], [0, 0, 1, 1], [], []>} : vector<8x128xf32>, vector<128x1024xf32>, vector<8x1024xf32> -> vector<8x1024xf32>
    %c0_6 = arith.constant 0 : index
    %c0_7 = arith.constant 0 : index
    %25 = vector.load %arg2[%c0_6, %c0_7] : memref<1x1024xf32, #tpu.memory_space<vmem>>, vector<1x1024xf32>
    %26 = vector.broadcast %25 : vector<1x1024xf32> to vector<8x1024xf32>
    %27 = arith.addf %24, %26 : vector<8x1024xf32>
    %c0_8 = arith.constant 0 : index
    %c0_9 = arith.constant 0 : index
    %28 = vector.load %arg3[%c0_8, %c0_9] : memref<32x128xf32, #tpu.memory_space<vmem>>, vector<32x128xf32>
    %29 = tpu.iota {dimensions = array<i32: 1>} : vector<8x128xi32>
    %c64_i32 = arith.constant 64 : i32
    %30 = vector.broadcast %c64_i32 : i32 to vector<8x128xi32>
    %31 = arith.cmpi sge, %29, %30 : vector<8x128xi32>
    %c96_i32 = arith.constant 96 : i32
    %32 = vector.broadcast %c96_i32 : i32 to vector<8x128xi32>
    %33 = arith.cmpi slt, %29, %32 : vector<8x128xi32>
    %34 = arith.andi %31, %33 : vector<8x128xi1>
    %cst_10 = arith.constant 1.000000e+00 : f32
    %cst_11 = arith.constant 5.000000e-01 : f32
    %35 = vector.broadcast %cst_10 : f32 to vector<8x128xf32>
    %36 = vector.broadcast %cst_11 : f32 to vector<8x128xf32>
    %37 = arith.select %34, %35, %36 : vector<8x128xi1>, vector<8x128xf32>
    %cst_12 = arith.constant 0.000000e+00 : f32
    %cst_13 = arith.constant 5.000000e-01 : f32
    %38 = vector.broadcast %cst_12 : f32 to vector<8x128xf32>
    %39 = vector.broadcast %cst_13 : f32 to vector<8x128xf32>
    %40 = arith.select %34, %38, %39 : vector<8x128xi1>, vector<8x128xf32>
    %cst_14 = arith.constant 0.000000e+00 : f32
    %41 = vector.broadcast %cst_14 : f32 to vector<8x32xf32>
    %cst_15 = arith.constant 0.000000e+00 : f32
    %42 = vector.broadcast %cst_15 : f32 to vector<8x32xf32>
    %43 = vector.extract_strided_slice %27 {offsets = [0, 0], sizes = [8, 128], strides = [1, 1]} : vector<8x1024xf32> to vector<8x128xf32>
    %cst_16 = arith.constant dense<0.000000e+00> : vector<8x128xf32>
    %44 = tpu.matmul %41, %28, %cst_16 {dimension_numbers = #tpu.dot_dimension_numbers<[1], [0], [0], [1], [0, 0, 1, 1], [], []>} : vector<8x32xf32>, vector<32x128xf32>, vector<8x128xf32> -> vector<8x128xf32>
    %45 = arith.addf %43, %44 : vector<8x128xf32>
    %46 = arith.mulf %37, %45 : vector<8x128xf32>
    %47 = math.tanh %46 : vector<8x128xf32>
    %48 = arith.mulf %37, %47 : vector<8x128xf32>
    %49 = arith.addf %48, %40 : vector<8x128xf32>
    %50 = vector.extract_strided_slice %49 {offsets = [0, 0], sizes = [8, 32], strides = [1, 1]} : vector<8x128xf32> to vector<8x32xf32>
    %51 = vector.extract_strided_slice %49 {offsets = [0, 32], sizes = [8, 32], strides = [1, 1]} : vector<8x128xf32> to vector<8x32xf32>
    %52 = vector.extract_strided_slice %49 {offsets = [0, 64], sizes = [8, 32], strides = [1, 1]} : vector<8x128xf32> to vector<8x32xf32>
    %53 = vector.extract_strided_slice %49 {offsets = [0, 96], sizes = [8, 32], strides = [1, 1]} : vector<8x128xf32> to vector<8x32xf32>
    %54 = arith.mulf %51, %42 : vector<8x32xf32>
    %55 = arith.mulf %50, %52 : vector<8x32xf32>
    %56 = arith.addf %54, %55 : vector<8x32xf32>
    %57 = math.tanh %56 : vector<8x32xf32>
    %58 = arith.mulf %53, %57 : vector<8x32xf32>
    %59 = vector.extract_strided_slice %27 {offsets = [0, 128], sizes = [8, 128], strides = [1, 1]} : vector<8x1024xf32> to vector<8x128xf32>
    %cst_17 = arith.constant dense<0.000000e+00> : vector<8x128xf32>
    %60 = tpu.matmul %58, %28, %cst_17 {dimension_numbers = #tpu.dot_dimension_numbers<[1], [0], [0], [1], [0, 0, 1, 1], [], []>} : vector<8x32xf32>, vector<32x128xf32>, vector<8x128xf32> -> vector<8x128xf32>
    %61 = arith.addf %59, %60 : vector<8x128xf32>
    %62 = arith.mulf %37, %61 : vector<8x128xf32>
    %63 = math.tanh %62 : vector<8x128xf32>
    %64 = arith.mulf %37, %63 : vector<8x128xf32>
    %65 = arith.addf %64, %40 : vector<8x128xf32>
    %66 = vector.extract_strided_slice %65 {offsets = [0, 0], sizes = [8, 32], strides = [1, 1]} : vector<8x128xf32> to vector<8x32xf32>
    %67 = vector.extract_strided_slice %65 {offsets = [0, 32], sizes = [8, 32], strides = [1, 1]} : vector<8x128xf32> to vector<8x32xf32>
    %68 = vector.extract_strided_slice %65 {offsets = [0, 64], sizes = [8, 32], strides = [1, 1]} : vector<8x128xf32> to vector<8x32xf32>
    %69 = vector.extract_strided_slice %65 {offsets = [0, 96], sizes = [8, 32], strides = [1, 1]} : vector<8x128xf32> to vector<8x32xf32>
    %70 = arith.mulf %67, %56 : vector<8x32xf32>
    %71 = arith.mulf %66, %68 : vector<8x32xf32>
    %72 = arith.addf %70, %71 : vector<8x32xf32>
    %73 = math.tanh %72 : vector<8x32xf32>
    %74 = arith.mulf %69, %73 : vector<8x32xf32>
    %75 = vector.extract_strided_slice %27 {offsets = [0, 256], sizes = [8, 128], strides = [1, 1]} : vector<8x1024xf32> to vector<8x128xf32>
    %cst_18 = arith.constant dense<0.000000e+00> : vector<8x128xf32>
    %76 = tpu.matmul %74, %28, %cst_18 {dimension_numbers = #tpu.dot_dimension_numbers<[1], [0], [0], [1], [0, 0, 1, 1], [], []>} : vector<8x32xf32>, vector<32x128xf32>, vector<8x128xf32> -> vector<8x128xf32>
    %77 = arith.addf %75, %76 : vector<8x128xf32>
    %78 = arith.mulf %37, %77 : vector<8x128xf32>
    %79 = math.tanh %78 : vector<8x128xf32>
    %80 = arith.mulf %37, %79 : vector<8x128xf32>
    %81 = arith.addf %80, %40 : vector<8x128xf32>
    %82 = vector.extract_strided_slice %81 {offsets = [0, 0], sizes = [8, 32], strides = [1, 1]} : vector<8x128xf32> to vector<8x32xf32>
    %83 = vector.extract_strided_slice %81 {offsets = [0, 32], sizes = [8, 32], strides = [1, 1]} : vector<8x128xf32> to vector<8x32xf32>
    %84 = vector.extract_strided_slice %81 {offsets = [0, 64], sizes = [8, 32], strides = [1, 1]} : vector<8x128xf32> to vector<8x32xf32>
    %85 = vector.extract_strided_slice %81 {offsets = [0, 96], sizes = [8, 32], strides = [1, 1]} : vector<8x128xf32> to vector<8x32xf32>
    %86 = arith.mulf %83, %72 : vector<8x32xf32>
    %87 = arith.mulf %82, %84 : vector<8x32xf32>
    %88 = arith.addf %86, %87 : vector<8x32xf32>
    %89 = math.tanh %88 : vector<8x32xf32>
    %90 = arith.mulf %85, %89 : vector<8x32xf32>
    %91 = vector.extract_strided_slice %27 {offsets = [0, 384], sizes = [8, 128], strides = [1, 1]} : vector<8x1024xf32> to vector<8x128xf32>
    %cst_19 = arith.constant dense<0.000000e+00> : vector<8x128xf32>
    %92 = tpu.matmul %90, %28, %cst_19 {dimension_numbers = #tpu.dot_dimension_numbers<[1], [0], [0], [1], [0, 0, 1, 1], [], []>} : vector<8x32xf32>, vector<32x128xf32>, vector<8x128xf32> -> vector<8x128xf32>
    %93 = arith.addf %91, %92 : vector<8x128xf32>
    %94 = arith.mulf %37, %93 : vector<8x128xf32>
    %95 = math.tanh %94 : vector<8x128xf32>
    %96 = arith.mulf %37, %95 : vector<8x128xf32>
    %97 = arith.addf %96, %40 : vector<8x128xf32>
    %98 = vector.extract_strided_slice %97 {offsets = [0, 0], sizes = [8, 32], strides = [1, 1]} : vector<8x128xf32> to vector<8x32xf32>
    %99 = vector.extract_strided_slice %97 {offsets = [0, 32], sizes = [8, 32], strides = [1, 1]} : vector<8x128xf32> to vector<8x32xf32>
    %100 = vector.extract_strided_slice %97 {offsets = [0, 64], sizes = [8, 32], strides = [1, 1]} : vector<8x128xf32> to vector<8x32xf32>
    %101 = vector.extract_strided_slice %97 {offsets = [0, 96], sizes = [8, 32], strides = [1, 1]} : vector<8x128xf32> to vector<8x32xf32>
    %102 = arith.mulf %99, %88 : vector<8x32xf32>
    %103 = arith.mulf %98, %100 : vector<8x32xf32>
    %104 = arith.addf %102, %103 : vector<8x32xf32>
    %105 = math.tanh %104 : vector<8x32xf32>
    %106 = arith.mulf %101, %105 : vector<8x32xf32>
    %107 = vector.extract_strided_slice %27 {offsets = [0, 512], sizes = [8, 128], strides = [1, 1]} : vector<8x1024xf32> to vector<8x128xf32>
    %cst_20 = arith.constant dense<0.000000e+00> : vector<8x128xf32>
    %108 = tpu.matmul %106, %28, %cst_20 {dimension_numbers = #tpu.dot_dimension_numbers<[1], [0], [0], [1], [0, 0, 1, 1], [], []>} : vector<8x32xf32>, vector<32x128xf32>, vector<8x128xf32> -> vector<8x128xf32>
    %109 = arith.addf %107, %108 : vector<8x128xf32>
    %110 = arith.mulf %37, %109 : vector<8x128xf32>
    %111 = math.tanh %110 : vector<8x128xf32>
    %112 = arith.mulf %37, %111 : vector<8x128xf32>
    %113 = arith.addf %112, %40 : vector<8x128xf32>
    %114 = vector.extract_strided_slice %113 {offsets = [0, 0], sizes = [8, 32], strides = [1, 1]} : vector<8x128xf32> to vector<8x32xf32>
    %115 = vector.extract_strided_slice %113 {offsets = [0, 32], sizes = [8, 32], strides = [1, 1]} : vector<8x128xf32> to vector<8x32xf32>
    %116 = vector.extract_strided_slice %113 {offsets = [0, 64], sizes = [8, 32], strides = [1, 1]} : vector<8x128xf32> to vector<8x32xf32>
    %117 = vector.extract_strided_slice %113 {offsets = [0, 96], sizes = [8, 32], strides = [1, 1]} : vector<8x128xf32> to vector<8x32xf32>
    %118 = arith.mulf %115, %104 : vector<8x32xf32>
    %119 = arith.mulf %114, %116 : vector<8x32xf32>
    %120 = arith.addf %118, %119 : vector<8x32xf32>
    %121 = math.tanh %120 : vector<8x32xf32>
    %122 = arith.mulf %117, %121 : vector<8x32xf32>
    %123 = vector.extract_strided_slice %27 {offsets = [0, 640], sizes = [8, 128], strides = [1, 1]} : vector<8x1024xf32> to vector<8x128xf32>
    %cst_21 = arith.constant dense<0.000000e+00> : vector<8x128xf32>
    %124 = tpu.matmul %122, %28, %cst_21 {dimension_numbers = #tpu.dot_dimension_numbers<[1], [0], [0], [1], [0, 0, 1, 1], [], []>} : vector<8x32xf32>, vector<32x128xf32>, vector<8x128xf32> -> vector<8x128xf32>
    %125 = arith.addf %123, %124 : vector<8x128xf32>
    %126 = arith.mulf %37, %125 : vector<8x128xf32>
    %127 = math.tanh %126 : vector<8x128xf32>
    %128 = arith.mulf %37, %127 : vector<8x128xf32>
    %129 = arith.addf %128, %40 : vector<8x128xf32>
    %130 = vector.extract_strided_slice %129 {offsets = [0, 0], sizes = [8, 32], strides = [1, 1]} : vector<8x128xf32> to vector<8x32xf32>
    %131 = vector.extract_strided_slice %129 {offsets = [0, 32], sizes = [8, 32], strides = [1, 1]} : vector<8x128xf32> to vector<8x32xf32>
    %132 = vector.extract_strided_slice %129 {offsets = [0, 64], sizes = [8, 32], strides = [1, 1]} : vector<8x128xf32> to vector<8x32xf32>
    %133 = vector.extract_strided_slice %129 {offsets = [0, 96], sizes = [8, 32], strides = [1, 1]} : vector<8x128xf32> to vector<8x32xf32>
    %134 = arith.mulf %131, %120 : vector<8x32xf32>
    %135 = arith.mulf %130, %132 : vector<8x32xf32>
    %136 = arith.addf %134, %135 : vector<8x32xf32>
    %137 = math.tanh %136 : vector<8x32xf32>
    %138 = arith.mulf %133, %137 : vector<8x32xf32>
    %139 = vector.extract_strided_slice %27 {offsets = [0, 768], sizes = [8, 128], strides = [1, 1]} : vector<8x1024xf32> to vector<8x128xf32>
    %cst_22 = arith.constant dense<0.000000e+00> : vector<8x128xf32>
    %140 = tpu.matmul %138, %28, %cst_22 {dimension_numbers = #tpu.dot_dimension_numbers<[1], [0], [0], [1], [0, 0, 1, 1], [], []>} : vector<8x32xf32>, vector<32x128xf32>, vector<8x128xf32> -> vector<8x128xf32>
    %141 = arith.addf %139, %140 : vector<8x128xf32>
    %142 = arith.mulf %37, %141 : vector<8x128xf32>
    %143 = math.tanh %142 : vector<8x128xf32>
    %144 = arith.mulf %37, %143 : vector<8x128xf32>
    %145 = arith.addf %144, %40 : vector<8x128xf32>
    %146 = vector.extract_strided_slice %145 {offsets = [0, 0], sizes = [8, 32], strides = [1, 1]} : vector<8x128xf32> to vector<8x32xf32>
    %147 = vector.extract_strided_slice %145 {offsets = [0, 32], sizes = [8, 32], strides = [1, 1]} : vector<8x128xf32> to vector<8x32xf32>
    %148 = vector.extract_strided_slice %145 {offsets = [0, 64], sizes = [8, 32], strides = [1, 1]} : vector<8x128xf32> to vector<8x32xf32>
    %149 = vector.extract_strided_slice %145 {offsets = [0, 96], sizes = [8, 32], strides = [1, 1]} : vector<8x128xf32> to vector<8x32xf32>
    %150 = arith.mulf %147, %136 : vector<8x32xf32>
    %151 = arith.mulf %146, %148 : vector<8x32xf32>
    %152 = arith.addf %150, %151 : vector<8x32xf32>
    %153 = math.tanh %152 : vector<8x32xf32>
    %154 = arith.mulf %149, %153 : vector<8x32xf32>
    %155 = vector.extract_strided_slice %27 {offsets = [0, 896], sizes = [8, 128], strides = [1, 1]} : vector<8x1024xf32> to vector<8x128xf32>
    %cst_23 = arith.constant dense<0.000000e+00> : vector<8x128xf32>
    %156 = tpu.matmul %154, %28, %cst_23 {dimension_numbers = #tpu.dot_dimension_numbers<[1], [0], [0], [1], [0, 0, 1, 1], [], []>} : vector<8x32xf32>, vector<32x128xf32>, vector<8x128xf32> -> vector<8x128xf32>
    %157 = arith.addf %155, %156 : vector<8x128xf32>
    %158 = arith.mulf %37, %157 : vector<8x128xf32>
    %159 = math.tanh %158 : vector<8x128xf32>
    %160 = arith.mulf %37, %159 : vector<8x128xf32>
    %161 = arith.addf %160, %40 : vector<8x128xf32>
    %162 = vector.extract_strided_slice %161 {offsets = [0, 0], sizes = [8, 32], strides = [1, 1]} : vector<8x128xf32> to vector<8x32xf32>
    %163 = vector.extract_strided_slice %161 {offsets = [0, 32], sizes = [8, 32], strides = [1, 1]} : vector<8x128xf32> to vector<8x32xf32>
    %164 = vector.extract_strided_slice %161 {offsets = [0, 64], sizes = [8, 32], strides = [1, 1]} : vector<8x128xf32> to vector<8x32xf32>
    %165 = vector.extract_strided_slice %161 {offsets = [0, 96], sizes = [8, 32], strides = [1, 1]} : vector<8x128xf32> to vector<8x32xf32>
    %166 = arith.mulf %163, %152 : vector<8x32xf32>
    %167 = arith.mulf %162, %164 : vector<8x32xf32>
    %168 = arith.addf %166, %167 : vector<8x32xf32>
    %169 = math.tanh %168 : vector<8x32xf32>
    %170 = arith.mulf %165, %169 : vector<8x32xf32>
    %c0_24 = arith.constant 0 : index
    %c0_25 = arith.constant 0 : index
    %171 = vector.load %arg4[%c0_24, %c0_25] : memref<32x128xf32, #tpu.memory_space<vmem>>, vector<32x128xf32>
    %cst_26 = arith.constant dense<0.000000e+00> : vector<8x128xf32>
    %172 = tpu.matmul %170, %171, %cst_26 {dimension_numbers = #tpu.dot_dimension_numbers<[1], [0], [0], [1], [0, 0, 1, 1], [], []>} : vector<8x32xf32>, vector<32x128xf32>, vector<8x128xf32> -> vector<8x128xf32>
    %c0_27 = arith.constant 0 : index
    %c0_28 = arith.constant 0 : index
    %173 = vector.load %arg5[%c0_27, %c0_28] : memref<1x128xf32, #tpu.memory_space<vmem>>, vector<1x128xf32>
    %174 = vector.broadcast %173 : vector<1x128xf32> to vector<8x128xf32>
    %175 = arith.addf %172, %174 : vector<8x128xf32>
    %cst_29 = arith.constant 0.000000e+00 : f32
    %176 = vector.broadcast %cst_29 : f32 to vector<8x128xf32>
    %177 = arith.maximumf %175, %176 : vector<8x128xf32>
    %c0_30 = arith.constant 0 : index
    %c0_31 = arith.constant 0 : index
    %178 = vector.load %arg6[%c0_30, %c0_31] : memref<128x32xf32, #tpu.memory_space<vmem>>, vector<128x32xf32>
    %cst_32 = arith.constant dense<0.000000e+00> : vector<8x32xf32>
    %179 = tpu.matmul %177, %178, %cst_32 {dimension_numbers = #tpu.dot_dimension_numbers<[1], [0], [0], [1], [0, 0, 1, 1], [], []>} : vector<8x128xf32>, vector<128x32xf32>, vector<8x32xf32> -> vector<8x32xf32>
    %c0_33 = arith.constant 0 : index
    %c0_34 = arith.constant 0 : index
    %180 = vector.load %arg7[%c0_33, %c0_34] : memref<1x32xf32, #tpu.memory_space<vmem>>, vector<1x32xf32>
    %181 = vector.broadcast %180 : vector<1x32xf32> to vector<8x32xf32>
    %182 = arith.addf %179, %181 : vector<8x32xf32>
    %183 = vector.extract_strided_slice %182 {offsets = [0, 0], sizes = [2, 32], strides = [1, 1]} : vector<8x32xf32> to vector<2x32xf32>
    %c0_35 = arith.constant 0 : index
    %c0_36 = arith.constant 0 : index
    %184 = vector.load %arg8[%c0_35, %c0_36] : memref<2x32xf32, #tpu.memory_space<vmem>>, vector<2x32xf32>
    tpu.vector_store %arg8[%c0_35, %c0_36], %183 {strides = array<i32>} : memref<2x32xf32, #tpu.memory_space<vmem>>, vector<2x32xf32>,
    return
  }
}

</mosaic_0001>

<bundles_post_ra>
// kernel: aernn_encoder_forward.1
= control target key start
LH: loop header
LB: loop body
LE: loop exit
PB: predicated region body
PF: predicated region fallthrough
CT: control target
= control target key end

     0   :  { %13 = vsyncpa [#allocation3], 0  ;;  %s1243_s0 = inlined_call_operand.vmem [shape: f32[2,128], index: 0, kind: input, shape index: {}]   ;;  %s1244_s1 = inlined_call_operand.hbm [shape: f32[128,1024], index: 1, kind: input, shape index: {}]   ;;  %s1245_s2 = inlined_call_operand.vmem [shape: f32[1,1024], index: 2, kind: input, shape index: {}]   ;;  %s1246_s3 = inlined_call_operand.vmem [shape: f32[32,128], index: 3, kind: input, shape index: {}]   ;;  %s1247_s4 = inlined_call_operand.vmem [shape: f32[32,128], index: 4, kind: input, shape index: {}]   ;;  %s1248_s5 = inlined_call_operand.vmem [shape: f32[1,128], index: 5, kind: input, shape index: {}]   ;;  %s1249_s6 = inlined_call_operand.vmem [shape: f32[128,32], index: 6, kind: input, shape index: {}]   ;;  %s1250_s7 = inlined_call_operand.vmem [shape: f32[1,32], index: 7, kind: input, shape index: {}]   ;;  %s1251_s8 = inlined_call_operand.hbm [shape: f32[2,32], index: 8, kind: output, shape index: {}]  }
   0x1   :  { %14 = vsyncpa [#allocation4], 0  ;;  %s21_s29 = sshll.u32 %s1244_s1, 4  ;;  %s947_s30 = smov [#allocation2]   ;;  %s22_s29 = int_to_ptr.hbm [resolvable:$true] %s21_s29 }
   0x2   :  { %s23_s9 = sshll.u32 %s947_s30, 4  ;;  %s948_s10 = smov 1024   ;;  %s24_s9 = int_to_ptr.vmem [resolvable:$true] %s23_s9 }
   0x3   :  { %s949_s11 = smov 64  }
   0x4   :  { %29 = dma.hbm_to_vmem [thread:$0]  %s22_s29, 16384, %s24_s9, [#allocation3], %s948_s10, %s948_s10, %s949_s11  }
   0x5   :  { %943 = dma.done.wait [#allocation3], 16384  }
   0x6   :  { %944 = vsyncadd [#allocation3], 4294950912  ;;  %v181_v0 = vld [vmem:[#allocation2 + $0x3c0] sm:$0xff]  ;;  %v47_v9 = vlaneseq  ;;  %v1013_v40 = vld [vmem:[%s1246_s3 + $0x18] sm:$0xff]  ;;  %v950_v44 = vmov 0.0   ;;  %v951_v51 = vmov 0.5  }
   0x7   :  { %v173_v1 = vld [vmem:[#allocation2 + $0x380] sm:$0xff]  ;;  %207 = vmatpush.msra.mxu0 %v181_v0  ;;  %v1019_v41 = vld [vmem:[%s1246_s3 + $0x10] sm:$0xff]  ;;  %v1025_v42 = vld [vmem:[%s1246_s3 + $0x8] sm:$0xff]  ;;  %vm378_vm5 = vcmask 261120   ;;  %s953_s13 = smov [#allocation5]   ;;  %s836_s17 = sshll.u32 %s1251_s8, 4  ;;  %s837_s17 = int_to_ptr.hbm [resolvable:$true] %s836_s17 }
   0x8   :  { %v165_v2 = vld [vmem:[#allocation2 + $0x340] sm:$0xff]  ;;  %v48_v13 = vshrl.u32 %v47_v9, 7  ;;  %v372_v46 = vand.u32 127, %v47_v9  ;;  %v182_v9 = vld [vmem:[#allocation2 + $0x3c8] sm:$0xff]  ;;  %s834_s14 = sshll.u32 %s953_s13, 4  ;;  %vm827_vm6 = vcmask 254976   ;;  %s835_s14 = int_to_ptr.vmem [resolvable:$true] %s834_s14 }
   0x9   :  { %208 = vmatpush.msra.mxu0 %v173_v1  ;;  %v157_v3 = vld [vmem:[#allocation2 + $0x300] sm:$0xff]  ;;  %227 = vmatpush.msra.mxu1 %v182_v9 }
   0xa   :  { %v149_v4 = vld [vmem:[#allocation2 + $0x2c0] sm:$0xff]  ;;  %vm49_vm0 = vcmp.eq.s32.totalorder %v48_v13, 0  ;;  %vm55_vm1 = vcmp.eq.s32.totalorder %v48_v13, 1  ;;  %vm373_vm2 = vcmp.ge.s32.totalorder %v372_v46, 64  ;;  %vm374_vm3 = vcmp.lt.s32.totalorder %v372_v46, 96  ;;  %v166_v13 = vld [vmem:[#allocation2 + $0x348] sm:$0xff] }
   0xb   :  { %209 = vmatpush.msra.mxu0 %v165_v2  ;;  %v141_v5 = vld [vmem:[#allocation2 + $0x280] sm:$0xff]  ;;  %vm375_vm4 = vmand %vm373_vm2, %vm374_vm3  ;;  %v183_v2 = vld [vmem:[#allocation2 + $0x3d0] sm:$0xff] }
   0xc   :  { %v133_v6 = vld [vmem:[#allocation2 + $0x240] sm:$0xff]  ;;  %v1048_v52 = vsel %vm375_vm4, 1.0, %v951_v51  ;;  %v1051_v57 = vsel %vm375_vm4, 0.0, %v951_v51  ;;  %247 = vmatpush.msra.mxu2 %v183_v2  ;;  %v131_v46 = vld [vmem:[#allocation2 + $0x230] sm:$0xff] }
   0xd   :  { %210 = vmatpush.msra.mxu0 %v157_v3  ;;  %v125_v7 = vld [vmem:[#allocation2 + $0x200] sm:$0xff]  ;;  %v175_v3 = vld [vmem:[#allocation2 + $0x390] sm:$0xff] }
   0xe   :  { %v117_v8 = vld [vmem:[#allocation2 + $0x1c0] sm:$0xff]  ;;  %248 = vmatpush.msra.mxu2 %v175_v3  ;;  %v107_v51 = vld [vmem:[#allocation2 + $0x170] sm:$0xff] }
   0xf   :  { %211 = vmatpush.msra.mxu0 %v149_v4  ;;  %v109_v10 = vld [vmem:[#allocation2 + $0x180] sm:$0xff]  ;;  %v167_v4 = vld [vmem:[#allocation2 + $0x350] sm:$0xff] }
  0x10   :  { %v101_v11 = vld [vmem:[#allocation2 + $0x140] sm:$0xff]  ;;  %249 = vmatpush.msra.mxu2 %v167_v4 }
  0x11   :  { %212 = vmatpush.msra.mxu0 %v141_v5  ;;  %v46_v12 = vld [vmem:[%s1243_s0] sm:$0x3]  ;;  %v159_v5 = vld [vmem:[#allocation2 + $0x310] sm:$0xff] }
  0x12   :  { %v93_v14 = vld [vmem:[#allocation2 + $0x100] sm:$0xff]  ;;  %v52_v16 = vperm.slane %v46_v12, 0  ;;  %v58_v17 = vperm.slane %v46_v12, 1  ;;  %250 = vmatpush.msra.mxu2 %v159_v5  ;;  %v119_v12 = vld [vmem:[#allocation2 + $0x1d0] sm:$0xff] }
  0x13   :  { %213 = vmatpush.msra.mxu0 %v133_v6  ;;  %v85_v15 = vld [vmem:[#allocation2 + $0xc0] sm:$0xff]  ;;  %v151_v6 = vld [vmem:[#allocation2 + $0x2d0] sm:$0xff] }
  0x14   :  { %v77_v18 = vld [vmem:[#allocation2 + $0x80] sm:$0xff]  ;;  %v53_v20 = vsel %vm49_vm0, %v52_v16, 0.0  ;;  %v59_v21 = vsel %vm55_vm1, %v58_v17, 0.0  ;;  %251 = vmatpush.msra.mxu2 %v151_v6  ;;  %v103_v16 = vld [vmem:[#allocation2 + $0x150] sm:$0xff]  ;;  %v150_v17 = vld [vmem:[#allocation2 + $0x2c8] sm:$0xff] }
  0x15   :  { %214 = vmatpush.msra.mxu0 %v125_v7  ;;  %v69_v19 = vld [vmem:[#allocation2 + $0x40] sm:$0xff]  ;;  %v1007_v24 = vadd.f32 %v59_v21, %v53_v20  ;;  %v143_v7 = vld [vmem:[#allocation2 + $0x290] sm:$0xff]  ;;  %v134_v21 = vld [vmem:[#allocation2 + $0x248] sm:$0xff] }
  0x16   :  { %v61_v22 = vld [vmem:[#allocation2] sm:$0xff]  ;;  %252 = vmatpush.msra.mxu2 %v143_v7  ;;  %v87_v20 = vld [vmem:[#allocation2 + $0xd0] sm:$0xff] }
  0x17   :  { %215 = vmatpush.msra.mxu0 %v117_v8  ;;  %v185_v23 = vld [vmem:[#allocation2 + $0x3e0] sm:$0xff]  ;;  %v135_v8 = vld [vmem:[#allocation2 + $0x250] sm:$0xff] }
  0x18   :  { %v177_v25 = vld [vmem:[#allocation2 + $0x3a0] sm:$0xff]  ;;  %253 = vmatpush.msra.mxu2 %v135_v8 }
  0x19   :  { %216 = vmatpush.msra.mxu0 %v109_v10  ;;  %v169_v26 = vld [vmem:[#allocation2 + $0x360] sm:$0xff]  ;;  %v127_v10 = vld [vmem:[#allocation2 + $0x210] sm:$0xff] }
  0x1a   :  { %v161_v27 = vld [vmem:[#allocation2 + $0x320] sm:$0xff]  ;;  %254 = vmatpush.msra.mxu2 %v127_v10 }
  0x1b   :  { %217 = vmatpush.msra.mxu0 %v101_v11  ;;  %v153_v28 = vld [vmem:[#allocation2 + $0x2e0] sm:$0xff]  ;;  %v174_v11 = vld [vmem:[#allocation2 + $0x388] sm:$0xff] }
  0x1c   :  { %v145_v29 = vld [vmem:[#allocation2 + $0x2a0] sm:$0xff]  ;;  %228 = vmatpush.msra.mxu1 %v174_v11  ;;  %255 = vmatpush.msra.mxu2 %v119_v12 }
  0x1d   :  { %218 = vmatpush.msra.mxu0 %v93_v14  ;;  %v137_v30 = vld [vmem:[#allocation2 + $0x260] sm:$0xff]  ;;  %v111_v14 = vld [vmem:[#allocation2 + $0x190] sm:$0xff] }
  0x1e   :  { %v129_v31 = vld [vmem:[#allocation2 + $0x220] sm:$0xff]  ;;  %229 = vmatpush.msra.mxu1 %v166_v13  ;;  %256 = vmatpush.msra.mxu2 %v111_v14 }
  0x1f   :  { %219 = vmatpush.msra.mxu0 %v85_v15  ;;  %v121_v32 = vld [vmem:[#allocation2 + $0x1e0] sm:$0xff]  ;;  %v158_v15 = vld [vmem:[#allocation2 + $0x308] sm:$0xff] }
  0x20   :  { %v113_v33 = vld [vmem:[#allocation2 + $0x1a0] sm:$0xff]  ;;  %230 = vmatpush.msra.mxu1 %v158_v15  ;;  %257 = vmatpush.msra.mxu2 %v103_v16 }
  0x21   :  { %220 = vmatpush.msra.mxu0 %v77_v18  ;;  %v105_v34 = vld [vmem:[#allocation2 + $0x160] sm:$0xff]  ;;  %v95_v18 = vld [vmem:[#allocation2 + $0x110] sm:$0xff] }
  0x22   :  { %v97_v35 = vld [vmem:[#allocation2 + $0x120] sm:$0xff]  ;;  %231 = vmatpush.msra.mxu1 %v150_v17  ;;  %258 = vmatpush.msra.mxu2 %v95_v18 }
  0x23   :  { %221 = vmatpush.msra.mxu0 %v69_v19  ;;  %v89_v36 = vld [vmem:[#allocation2 + $0xe0] sm:$0xff]  ;;  %v142_v19 = vld [vmem:[#allocation2 + $0x288] sm:$0xff] }
  0x24   :  { %v81_v37 = vld [vmem:[#allocation2 + $0xa0] sm:$0xff]  ;;  %232 = vmatpush.msra.mxu1 %v142_v19  ;;  %259 = vmatpush.msra.mxu2 %v87_v20 }
  0x25   :  { %222 = vmatpush.msra.mxu0 %v61_v22  ;;  %v73_v38 = vld [vmem:[#allocation2 + $0x60] sm:$0xff]  ;;  %v79_v22 = vld [vmem:[#allocation2 + $0x90] sm:$0xff] }
  0x26   :  { %223 = vmatmul.f32.vlgmr.msra.gmra.mxu0 %v1007_v24  ;;  %v65_v39 = vld [vmem:[#allocation2 + $0x20] sm:$0xff]  ;;  %233 = vmatpush.msra.mxu1 %v134_v21 }
  0x27   :  { %287 = vmatpush.msrb.mxu0 %v185_v23  ;;  %v1031_v43 = vld [vmem:[%s1246_s3] sm:$0xff]  ;;  %v126_v23 = vld [vmem:[#allocation2 + $0x208] sm:$0xff]  ;;  %260 = vmatpush.msra.mxu2 %v79_v22 }
  0x28   :  { %v1043_v47 = vld [vmem:[%s1245_s2] sm:$0xff]  ;;  %s952_s2 = smov 32   ;;  %234 = vmatpush.msra.mxu1 %v126_v23 }
  0x29   :  { %288 = vmatpush.msrb.mxu0 %v177_v25  ;;  %v191_v49 = vperm.slane %v1043_v47, 0  ;;  %v71_v25 = vld [vmem:[#allocation2 + $0x50] sm:$0xff]  ;;  %v193_v19 = vperm.slane %v1043_v47, 2 }
  0x2a   :  { %261 = vmatpush.msra.mxu2 %v71_v25 }
  0x2b   :  { %289 = vmatpush.msrb.mxu0 %v169_v26  ;;  %v118_v26 = vld [vmem:[#allocation2 + $0x1c8] sm:$0xff] }
  0x2c   :  { %235 = vmatpush.msra.mxu1 %v118_v26 }
  0x2d   :  { %290 = vmatpush.msrb.mxu0 %v161_v27  ;;  %v63_v27 = vld [vmem:[#allocation2 + $0x10] sm:$0xff] }
  0x2e   :  { %262 = vmatpush.msra.mxu2 %v63_v27 }
  0x2f   :  { %291 = vmatpush.msrb.mxu0 %v153_v28  ;;  %v110_v28 = vld [vmem:[#allocation2 + $0x188] sm:$0xff]  ;;  %263 = vmatmul.f32.vlgmr.msra.gmra.mxu2 %v1007_v24 }
  0x30   :  { %236 = vmatpush.msra.mxu1 %v110_v28 }
  0x31   :  { %292 = vmatpush.msrb.mxu0 %v145_v29 }
  0x33   :  { %293 = vmatpush.msrb.mxu0 %v137_v30  ;;  %v187_v30 = vld [vmem:[#allocation2 + $0x3f0] sm:$0xff] }
  0x34   :  { %327 = vmatpush.msrb.mxu2 %v187_v30 }
  0x35   :  { %294 = vmatpush.msrb.mxu0 %v129_v31 }
  0x37   :  { %295 = vmatpush.msrb.mxu0 %v121_v32  ;;  %v179_v32 = vld [vmem:[#allocation2 + $0x3b0] sm:$0xff] }
  0x38   :  { %328 = vmatpush.msrb.mxu2 %v179_v32 }
  0x39   :  { %296 = vmatpush.msrb.mxu0 %v113_v33  ;;  %v102_v33 = vld [vmem:[#allocation2 + $0x148] sm:$0xff] }
  0x3a   :  { %237 = vmatpush.msra.mxu1 %v102_v33  ;;  %v184_v33 = vld [vmem:[#allocation2 + $0x3d8] sm:$0xff] }
  0x3b   :  { %297 = vmatpush.msrb.mxu0 %v105_v34  ;;  %v171_v34 = vld [vmem:[#allocation2 + $0x370] sm:$0xff]  ;;  %267 = vmatpush.msra.mxu3 %v184_v33 }
  0x3c   :  { %329 = vmatpush.msrb.mxu2 %v171_v34  ;;  %v176_v34 = vld [vmem:[#allocation2 + $0x398] sm:$0xff] }
  0x3d   :  { %298 = vmatpush.msrb.mxu0 %v97_v35  ;;  %v94_v35 = vld [vmem:[#allocation2 + $0x108] sm:$0xff]  ;;  %268 = vmatpush.msra.mxu3 %v176_v34 }
  0x3e   :  { %238 = vmatpush.msra.mxu1 %v94_v35  ;;  %v168_v35 = vld [vmem:[#allocation2 + $0x358] sm:$0xff] }
  0x3f   :  { %299 = vmatpush.msrb.mxu0 %v89_v36  ;;  %v163_v36 = vld [vmem:[#allocation2 + $0x330] sm:$0xff]  ;;  %269 = vmatpush.msra.mxu3 %v168_v35 }
  0x40   :  { %330 = vmatpush.msrb.mxu2 %v163_v36  ;;  %v160_v36 = vld [vmem:[#allocation2 + $0x318] sm:$0xff] }
  0x41   :  { %300 = vmatpush.msrb.mxu0 %v81_v37  ;;  %v86_v37 = vld [vmem:[#allocation2 + $0xc8] sm:$0xff]  ;;  %270 = vmatpush.msra.mxu3 %v160_v36 }
  0x42   :  { %239 = vmatpush.msra.mxu1 %v86_v37  ;;  %v152_v37 = vld [vmem:[#allocation2 + $0x2d8] sm:$0xff] }
  0x43   :  { %301 = vmatpush.msrb.mxu0 %v73_v38  ;;  %v155_v38 = vld [vmem:[#allocation2 + $0x2f0] sm:$0xff]  ;;  %271 = vmatpush.msra.mxu3 %v152_v37 }
  0x44   :  { %331 = vmatpush.msrb.mxu2 %v155_v38  ;;  %v144_v38 = vld [vmem:[#allocation2 + $0x298] sm:$0xff] }
  0x45   :  { %302 = vmatpush.msrb.mxu0 %v65_v39  ;;  %v78_v39 = vld [vmem:[#allocation2 + $0x88] sm:$0xff]  ;;  %272 = vmatpush.msra.mxu3 %v144_v38 }
  0x46   :  { %303 = vmatmul.f32.vlgmr.msrb.gmra.mxu0 %v1007_v24  ;;  %240 = vmatpush.msra.mxu1 %v78_v39  ;;  %v136_v39 = vld [vmem:[#allocation2 + $0x258] sm:$0xff] }
  0x47   :  { %394 = vmatpush.msra.mxu0 %v1013_v40  ;;  %273 = vmatpush.msra.mxu3 %v136_v39 }
  0x49   :  { %395 = vmatpush.msra.mxu0 %v1019_v41 }
  0x4b   :  { %396 = vmatpush.msra.mxu0 %v1025_v42 }
  0x4d   :  { %397 = vmatpush.msra.mxu0 %v1031_v43 }
  0x4e   :  { %398 = vmatmul.f32.vlgmr.msra.gmra.mxu0 %v950_v44  ;;  %v147_v44 = vld [vmem:[#allocation2 + $0x2b0] sm:$0xff] }
  0x4f   :  { %582 = vmatpush.msrb.mxu0 %v1013_v40  ;;  %332 = vmatpush.msrb.mxu2 %v147_v44  ;;  %v128_v44 = vld [vmem:[#allocation2 + $0x218] sm:$0xff] }
  0x50   :  { %274 = vmatpush.msra.mxu3 %v128_v44 }
  0x51   :  { %583 = vmatpush.msrb.mxu0 %v1019_v41 }
  0x53   :  { %584 = vmatpush.msrb.mxu0 %v1025_v42 }
  0x55   :  { %585 = vmatpush.msrb.mxu0 %v1031_v43 }
  0xa3   :  { %v224_v45 = vpop.f32.mrf.mxu0 }
  0xa4   :  { %v225_v50 = vadd.f32 %v224_v45, %v191_v49  ;;  %v139_v45 = vld [vmem:[#allocation2 + $0x270] sm:$0xff] }
  0xa5   :  { %333 = vmatpush.msrb.mxu2 %v139_v45  ;;  %v123_v49 = vld [vmem:[#allocation2 + $0x1f0] sm:$0xff]  ;;  %v120_v45 = vld [vmem:[#allocation2 + $0x1d8] sm:$0xff] }
  0xa6   :  { %275 = vmatpush.msra.mxu3 %v120_v45 }
  0xa7   :  { %334 = vmatpush.msrb.mxu2 %v131_v46  ;;  %v112_v46 = vld [vmem:[#allocation2 + $0x198] sm:$0xff] }
  0xa8   :  { %276 = vmatpush.msra.mxu3 %v112_v46  ;;  %v186_v46 = vld [vmem:[#allocation2 + $0x3e8] sm:$0xff] }
  0xa9   :  { %335 = vmatpush.msrb.mxu2 %v123_v49  ;;  %v104_v49 = vld [vmem:[#allocation2 + $0x158] sm:$0xff] }
  0xaa   :  { %277 = vmatpush.msra.mxu3 %v104_v49  ;;  %v178_v49 = vld [vmem:[#allocation2 + $0x3a8] sm:$0xff] }
  0xc3   :  { %v1045_v48 = vpop.f32.mrf.mxu0 }
  0xcb   :  { %v399_v53 = vpop.f32.mrf.mxu0 }
  0xcc   :  { %v402_v54 = vadd.f32 %v399_v53, %v225_v50  ;;  %v115_v50 = vld [vmem:[#allocation2 + $0x1b0] sm:$0xff] }
  0xcd   :  { %336 = vmatpush.msrb.mxu2 %v115_v50  ;;  %v99_v53 = vld [vmem:[#allocation2 + $0x130] sm:$0xff]  ;;  %v96_v50 = vld [vmem:[#allocation2 + $0x118] sm:$0xff] }
  0xce   :  { %v403_v55 = vmul.f32 %v402_v54, %v1048_v52  ;;  %v91_v54 = vld [vmem:[#allocation2 + $0xf0] sm:$0xff]  ;;  %278 = vmatpush.msra.mxu3 %v96_v50  ;;  %v170_v50 = vld [vmem:[#allocation2 + $0x368] sm:$0xff] }
  0xcf   :  { %337 = vmatpush.msrb.mxu2 %v107_v51  ;;  %v88_v51 = vld [vmem:[#allocation2 + $0xd8] sm:$0xff] }
  0xd0   :  { %863 = vtanh.f32 %v403_v55  ;;  %v83_v55 = vld [vmem:[#allocation2 + $0xb0] sm:$0xff]  ;;  %279 = vmatpush.msra.mxu3 %v88_v51  ;;  %v162_v51 = vld [vmem:[#allocation2 + $0x328] sm:$0xff] }
  0xd1   :  { %338 = vmatpush.msrb.mxu2 %v99_v53  ;;  %v80_v53 = vld [vmem:[#allocation2 + $0x98] sm:$0xff] }
  0xd2   :  { %280 = vmatpush.msra.mxu3 %v80_v53  ;;  %v154_v53 = vld [vmem:[#allocation2 + $0x2e8] sm:$0xff] }
  0xd3   :  { %339 = vmatpush.msrb.mxu2 %v91_v54  ;;  %v72_v54 = vld [vmem:[#allocation2 + $0x58] sm:$0xff] }
  0xd4   :  { %281 = vmatpush.msra.mxu3 %v72_v54  ;;  %v146_v54 = vld [vmem:[#allocation2 + $0x2a8] sm:$0xff] }
  0xd5   :  { %340 = vmatpush.msrb.mxu2 %v83_v55  ;;  %v64_v55 = vld [vmem:[#allocation2 + $0x18] sm:$0xff] }
  0xd6   :  { %v864_v56 = vpop.eup %863  ;;  %282 = vmatpush.msra.mxu3 %v64_v55  ;;  %v138_v55 = vld [vmem:[#allocation2 + $0x268] sm:$0xff] }
  0xd7   :  { %v405_v58 = vmul.f32 %v864_v56, %v1048_v52  ;;  %v75_v56 = vld [vmem:[#allocation2 + $0x70] sm:$0xff]  ;;  %283 = vmatmul.f32.vlgmr.msra.gmra.mxu3 %v1007_v24 }
  0xd8   :  { %341 = vmatpush.msrb.mxu2 %v75_v56 }
  0xd9   :  { %v1055_v59 = vadd.f32 %v405_v58, %v1051_v57  ;;  %v67_v58 = vld [vmem:[#allocation2 + $0x30] sm:$0xff] }
  0xda   :  { %342 = vmatpush.msrb.mxu2 %v67_v58  ;;  %v188_v58 = vld [vmem:[#allocation2 + $0x3f8] sm:$0xff] }
  0xdb   :  { %409 = vrot.lane.b32.xlu0 %v1055_v59, %s949_s11  ;;  %v407_v62 = vmul.f32 0.0, %v1055_v59  ;;  %343 = vmatmul.f32.vlgmr.msrb.gmra.mxu2 %v1007_v24 }
  0xdc   :  { %441 = vmatpush.msra.mxu2 %v1013_v40  ;;  %347 = vmatpush.msrb.mxu3 %v188_v58  ;;  %v122_v58 = vld [vmem:[#allocation2 + $0x1e8] sm:$0xff] }
  0xde   :  { %442 = vmatpush.msra.mxu2 %v1019_v41 }
  0xe0   :  { %443 = vmatpush.msra.mxu2 %v1025_v42 }
  0xe2   :  { %444 = vmatpush.msra.mxu2 %v1031_v43 }
  0xe4   :  { %488 = vmatpush.msrb.mxu2 %v1013_v40 }
  0xe6   :  { %489 = vmatpush.msrb.mxu2 %v1019_v41 }
  0xe8   :  { %490 = vmatpush.msrb.mxu2 %v1025_v42 }
  0xea   :  { %491 = vmatpush.msrb.mxu2 %v1031_v43 }
 0x14d   :  { %v410_v60 = vpop.permute.xlu0 %409 }
 0x14e   :  { %v412_v61 = vmul.f32 %v410_v60, %v1055_v59  ;;  %v62_v60 = vld [vmem:[#allocation2 + $0x8] sm:$0xff] }
 0x150   :  { %414 = vrot.lane.b32.xlu0 %v412_v61, %s952_s2 }
 0x1c2   :  { %v415_v63 = vpop.permute.xlu0 %414 }
 0x1c3   :  { %v1062_v0 = vadd.f32 %v415_v63, %v407_v62  ;;  %v264_v62 = vpop.f32.mrf.mxu2 }
 0x1c4   :  { %v265_v20 = vadd.f32 %v264_v62, %v193_v19  ;;  %v164_v62 = vld [vmem:[#allocation2 + $0x338] sm:$0xff] }
 0x1c5   :  { %865 = vtanh.f32 %v1062_v0 }
 0x1cb   :  { %v866_v1 = vpop.eup %865  ;;  %v1084_v63 = vpop.f32.mrf.mxu2 }
 0x1cc   :  { %420 = vrot.lane.b32.xlu1 %v866_v1, %s949_s11  ;;  %v192_v1 = vperm.slane %v1043_v47, 1 }
 0x23e   :  { %v421_v29 = vpop.permute.xlu1 %420 }
 0x23f   :  { %v423_v31 = vmul.f32 %v421_v29, %v1055_v59  ;;  %v70_v59 = vld [vmem:[#allocation2 + $0x48] sm:$0xff] }
 0x240   :  { %241 = vmatpush.msra.mxu1 %v70_v59 }
 0x241   :  { %425 = vrot.lane.b32.xlu1 %v423_v31, %s952_s2 }
 0x242   :  { %242 = vmatpush.msra.mxu1 %v62_v60  ;;  %v180_v60 = vld [vmem:[#allocation2 + $0x3b8] sm:$0xff] }
 0x243   :  { %243 = vmatmul.f32.vlgmr.msra.gmra.mxu1 %v1007_v24  ;;  %348 = vmatpush.msrb.mxu3 %v180_v60  ;;  %v106_v60 = vld [vmem:[#allocation2 + $0x168] sm:$0xff] }
 0x244   :  { %307 = vmatpush.msrb.mxu1 %v186_v46 }
 0x246   :  { %308 = vmatpush.msrb.mxu1 %v178_v49 }
 0x248   :  { %309 = vmatpush.msrb.mxu1 %v170_v50 }
 0x24a   :  { %310 = vmatpush.msrb.mxu1 %v162_v51 }
 0x24c   :  { %311 = vmatpush.msrb.mxu1 %v154_v53 }
 0x24e   :  { %312 = vmatpush.msrb.mxu1 %v146_v54 }
 0x250   :  { %313 = vmatpush.msrb.mxu1 %v138_v55  ;;  %v756_v55 = vld [vmem:[%s1247_s4 + $0x18] sm:$0xff] }
 0x251   :  { %778 = vmatpush.msra.mxu0 %v756_v55 }
 0x2b3   :  { %v426_v61 = vpop.permute.xlu1 %425 }
 0x2b4   :  { %846 = vmatmul.msk.f32.vlgmr.msra.gmra.mxu2 %vm378_vm5, %v426_v61  ;;  %v172_v61 = vld [vmem:[#allocation2 + $0x378] sm:$0xff] }
 0x2b5   :  { %676 = vmatpush.msra.mxu2 %v1013_v40  ;;  %349 = vmatpush.msrb.mxu3 %v172_v61  ;;  %v98_v61 = vld [vmem:[#allocation2 + $0x128] sm:$0xff] }
 0x2b7   :  { %677 = vmatpush.msra.mxu2 %v1019_v41  ;;  %350 = vmatpush.msrb.mxu3 %v164_v62  ;;  %v90_v62 = vld [vmem:[#allocation2 + $0xe8] sm:$0xff] }
 0x2b9   :  { %678 = vmatpush.msra.mxu2 %v1025_v42 }
 0x2bb   :  { %679 = vmatpush.msra.mxu2 %v1031_v43 }
 0x2c0   :  { %v244_v2 = vpop.f32.mrf.mxu1 }
 0x2c1   :  { %v245_v3 = vadd.f32 %v244_v2, %v192_v1  ;;  %v156_v1 = vld [vmem:[#allocation2 + $0x2f8] sm:$0xff] }
 0x2c2   :  { %v148_v2 = vld [vmem:[#allocation2 + $0x2b8] sm:$0xff]  ;;  %351 = vmatpush.msrb.mxu3 %v156_v1  ;;  %v82_v1 = vld [vmem:[#allocation2 + $0xa8] sm:$0xff] }
 0x2c4   :  { %352 = vmatpush.msrb.mxu3 %v148_v2 }
 0x337   :  { %v446_v4 = vpop.f32.mrf.mxu2 }
 0x338   :  { %v449_v5 = vadd.f32 %v446_v4, %v245_v3  ;;  %v140_v3 = vld [vmem:[#allocation2 + $0x278] sm:$0xff] }
 0x339   :  { %v132_v4 = vld [vmem:[#allocation2 + $0x238] sm:$0xff]  ;;  %353 = vmatpush.msrb.mxu3 %v140_v3 }
 0x33a   :  { %v450_v6 = vmul.f32 %v449_v5, %v1048_v52  ;;  %v124_v5 = vld [vmem:[#allocation2 + $0x1f8] sm:$0xff] }
 0x33b   :  { %354 = vmatpush.msrb.mxu3 %v132_v4  ;;  %v74_v4 = vld [vmem:[#allocation2 + $0x68] sm:$0xff] }
 0x33c   :  { %867 = vtanh.f32 %v450_v6  ;;  %v116_v6 = vld [vmem:[#allocation2 + $0x1b8] sm:$0xff] }
 0x33d   :  { %355 = vmatpush.msrb.mxu3 %v124_v5  ;;  %v66_v5 = vld [vmem:[#allocation2 + $0x28] sm:$0xff] }
 0x33f   :  { %356 = vmatpush.msrb.mxu3 %v116_v6 }
 0x342   :  { %v868_v7 = vpop.eup %867 }
 0x343   :  { %v452_v8 = vmul.f32 %v868_v7, %v1048_v52  ;;  %v108_v7 = vld [vmem:[#allocation2 + $0x178] sm:$0xff] }
 0x344   :  { %357 = vmatpush.msrb.mxu3 %v108_v7  ;;  %v196_v7 = vperm.slane %v1043_v47, 5 }
 0x345   :  { %v453_v9 = vadd.f32 %v452_v8, %v1051_v57  ;;  %v100_v8 = vld [vmem:[#allocation2 + $0x138] sm:$0xff] }
 0x346   :  { %358 = vmatpush.msrb.mxu3 %v100_v8 }
 0x347   :  { %456 = vrot.lane.b32.xlu2 %v453_v9, %s949_s11  ;;  %v454_v12 = vmul.f32 %v453_v9, %v1062_v0 }
 0x3a1   :  { %v457_v10 = vpop.permute.xlu2 %456 }
 0x3a2   :  { %v459_v11 = vmul.f32 %v457_v10, %v453_v9  ;;  %v84_v10 = vld [vmem:[#allocation2 + $0xb8] sm:$0xff] }
 0x3a4   :  { %461 = vrot.lane.b32.xlu2 %v459_v11, %s952_s2  ;;  %v76_v11 = vld [vmem:[#allocation2 + $0x78] sm:$0xff] }
 0x3fe   :  { %v462_v13 = vpop.permute.xlu2 %461 }
 0x3ff   :  { %v464_v14 = vadd.f32 %v462_v13, %v454_v12  ;;  %v68_v12 = vld [vmem:[#allocation2 + $0x38] sm:$0xff] }
 0x401   :  { %869 = vtanh.f32 %v464_v14 }
 0x407   :  { %v870_v15 = vpop.eup %869 }
 0x408   :  { %467 = vrot.lane.b32.xlu0 %v870_v15, %s949_s11 }
 0x47a   :  { %v468_v16 = vpop.permute.xlu0 %467 }
 0x47b   :  { %v470_v17 = vmul.f32 %v468_v16, %v453_v9  ;;  %v92_v9 = vld [vmem:[#allocation2 + $0xf8] sm:$0xff]  ;;  %v194_v16 = vperm.slane %v1043_v47, 3 }
 0x47c   :  { %359 = vmatpush.msrb.mxu3 %v92_v9 }
 0x47d   :  { %472 = vrot.lane.b32.xlu1 %v470_v17, %s952_s2 }
 0x47e   :  { %360 = vmatpush.msrb.mxu3 %v84_v10 }
 0x480   :  { %361 = vmatpush.msrb.mxu3 %v76_v11 }
 0x482   :  { %362 = vmatpush.msrb.mxu3 %v68_v12 }
 0x483   :  { %363 = vmatmul.f32.vlgmr.msrb.gmra.mxu3 %v1007_v24 }
 0x484   :  { %535 = vmatpush.msra.mxu3 %v1013_v40 }
 0x486   :  { %536 = vmatpush.msra.mxu3 %v1019_v41 }
 0x488   :  { %537 = vmatpush.msra.mxu3 %v1025_v42 }
 0x48a   :  { %538 = vmatpush.msra.mxu3 %v1031_v43 }
 0x48c   :  { %629 = vmatpush.msrb.mxu3 %v1013_v40 }
 0x48e   :  { %630 = vmatpush.msrb.mxu3 %v1019_v41 }
 0x490   :  { %631 = vmatpush.msrb.mxu3 %v1025_v42 }
 0x492   :  { %632 = vmatpush.msrb.mxu3 %v1031_v43 }
 0x4ef   :  { %v473_v18 = vpop.permute.xlu1 %472 }
 0x4f0   :  { %847 = vmatmul.msk.f32.vlgmr.msrb.gmra.mxu2 %vm378_vm5, %v473_v18 }
 0x573   :  { %v493_v21 = vpop.f32.mrf.mxu2 }
 0x574   :  { %v496_v22 = vadd.f32 %v493_v21, %v265_v20 }
 0x576   :  { %v497_v0 = vmul.f32 %v496_v22, %v1048_v52 }
 0x578   :  { %871 = vtanh.f32 %v497_v0 }
 0x57e   :  { %v872_v23 = vpop.eup %871 }
 0x57f   :  { %v499_v25 = vmul.f32 %v872_v23, %v1048_v52 }
 0x581   :  { %v500_v26 = vadd.f32 %v499_v25, %v1051_v57 }
 0x583   :  { %503 = vrot.lane.b32.xlu2 %v500_v26, %s949_s11  ;;  %v501_v29 = vmul.f32 %v500_v26, %v464_v14  ;;  %v284_v14 = vpop.f32.mrf.mxu3 }
 0x584   :  { %v285_v17 = vadd.f32 %v284_v14, %v194_v16 }
 0x58b   :  { %v1122_v15 = vpop.f32.mrf.mxu3 }
 0x5dd   :  { %v504_v27 = vpop.permute.xlu2 %503 }
 0x5de   :  { %v506_v28 = vmul.f32 %v504_v27, %v500_v26 }
 0x5e0   :  { %508 = vrot.lane.b32.xlu0 %v506_v28, %s952_s2 }
 0x652   :  { %v509_v30 = vpop.permute.xlu0 %508 }
 0x653   :  { %v1102_v31 = vadd.f32 %v509_v30, %v501_v29  ;;  %v195_v29 = vperm.slane %v1043_v47, 4 }
 0x655   :  { %873 = vtanh.f32 %v1102_v31  ;;  %v305_v30 = vadd.f32 %v1045_v48, %v195_v29 }
 0x65b   :  { %v874_v32 = vpop.eup %873 }
 0x65c   :  { %514 = vrot.lane.b32.xlu1 %v874_v32, %s949_s11 }
 0x6ce   :  { %v515_v56 = vpop.permute.xlu1 %514 }
 0x6cf   :  { %v517_v59 = vmul.f32 %v515_v56, %v500_v26  ;;  %v130_v56 = vld [vmem:[#allocation2 + $0x228] sm:$0xff] }
 0x6d0   :  { %314 = vmatpush.msrb.mxu1 %v130_v56  ;;  %v753_v56 = vld [vmem:[%s1247_s4] sm:$0xff] }
 0x6d1   :  { %519 = vrot.lane.b32.xlu2 %v517_v59, %s952_s2  ;;  %v114_v59 = vld [vmem:[#allocation2 + $0x1a8] sm:$0xff] }
 0x6d2   :  { %315 = vmatpush.msrb.mxu1 %v122_v58 }
 0x6d4   :  { %316 = vmatpush.msrb.mxu1 %v114_v59 }
 0x6d6   :  { %317 = vmatpush.msrb.mxu1 %v106_v60  ;;  %v802_v60 = vld [vmem:[%s1249_s6 + $0x78] sm:$0xff] }
 0x6d8   :  { %318 = vmatpush.msrb.mxu1 %v98_v61  ;;  %v801_v61 = vld [vmem:[%s1249_s6 + $0x70] sm:$0xff] }
 0x6da   :  { %319 = vmatpush.msrb.mxu1 %v90_v62  ;;  %v800_v62 = vld [vmem:[%s1249_s6 + $0x68] sm:$0xff] }
 0x6dc   :  { %320 = vmatpush.msrb.mxu1 %v82_v1  ;;  %v799_v1 = vld [vmem:[%s1249_s6 + $0x60] sm:$0xff] }
 0x6de   :  { %321 = vmatpush.msrb.mxu1 %v74_v4  ;;  %v796_v4 = vld [vmem:[%s1249_s6 + $0x48] sm:$0xff] }
 0x6e0   :  { %322 = vmatpush.msrb.mxu1 %v66_v5  ;;  %v795_v5 = vld [vmem:[%s1249_s6 + $0x40] sm:$0xff] }
 0x6e1   :  { %323 = vmatmul.f32.vlgmr.msrb.gmra.mxu1 %v1007_v24 }
 0x6e2   :  { %807 = vmatpush.msra.mxu1 %v802_v60 }
 0x6e4   :  { %808 = vmatpush.msra.mxu1 %v801_v61 }
 0x6e6   :  { %809 = vmatpush.msra.mxu1 %v800_v62 }
 0x6e8   :  { %810 = vmatpush.msra.mxu1 %v799_v1 }
 0x72b   :  { %v520_v13 = vpop.permute.xlu2 %519 }
 0x72c   :  { %848 = vmatmul.msk.f32.vlgmr.msra.gmra.mxu3 %vm378_vm5, %v520_v13 }
 0x72d   :  { %723 = vmatpush.msra.mxu3 %v1013_v40 }
 0x72f   :  { %724 = vmatpush.msra.mxu3 %v1019_v41 }
 0x731   :  { %725 = vmatpush.msra.mxu3 %v1025_v42 }
 0x733   :  { %726 = vmatpush.msra.mxu3 %v1031_v43 }
 0x75e   :  { %v324_v8 = vpop.f32.mrf.mxu1 }
 0x75f   :  { %v325_v9 = vadd.f32 %v324_v8, %v196_v7  ;;  %v793_v7 = vld [vmem:[%s1249_s6 + $0x30] sm:$0xff]  ;;  %v792_v8 = vld [vmem:[%s1249_s6 + $0x28] sm:$0xff] }
 0x7af   :  { %v540_v18 = vpop.f32.mrf.mxu3 }
 0x7b0   :  { %v543_v19 = vadd.f32 %v540_v18, %v285_v17 }
 0x7b2   :  { %v544_v20 = vmul.f32 %v543_v19, %v1048_v52 }
 0x7b4   :  { %875 = vtanh.f32 %v544_v20 }
 0x7ba   :  { %v876_v21 = vpop.eup %875 }
 0x7bb   :  { %v546_v40 = vmul.f32 %v876_v21, %v1048_v52 }
 0x7bd   :  { %v547_v41 = vadd.f32 %v546_v40, %v1051_v57 }
 0x7bf   :  { %550 = vrot.lane.b32.xlu0 %v547_v41, %s949_s11  ;;  %v548_v22 = vmul.f32 %v547_v41, %v1102_v31 }
 0x831   :  { %v551_v42 = vpop.permute.xlu0 %550 }
 0x832   :  { %v553_v43 = vmul.f32 %v551_v42, %v547_v41 }
 0x834   :  { %555 = vrot.lane.b32.xlu1 %v553_v43, %s952_s2  ;;  %v197_v43 = vperm.slane %v1043_v47, 6 }
 0x8a6   :  { %v556_v0 = vpop.permute.xlu1 %555 }
 0x8a7   :  { %v558_v23 = vadd.f32 %v556_v0, %v548_v22  ;;  %v345_v22 = vadd.f32 %v1084_v63, %v197_v43 }
 0x8a9   :  { %877 = vtanh.f32 %v558_v23 }
 0x8af   :  { %v878_v25 = vpop.eup %877 }
 0x8b0   :  { %561 = vrot.lane.b32.xlu2 %v878_v25, %s949_s11 }
 0x90a   :  { %v562_v26 = vpop.permute.xlu2 %561 }
 0x90b   :  { %v564_v27 = vmul.f32 %v562_v26, %v547_v41 }
 0x90d   :  { %566 = vrot.lane.b32.xlu0 %v564_v27, %s952_s2 }
 0x97f   :  { %v567_v28 = vpop.permute.xlu0 %566 }
 0x980   :  { %849 = vmatmul.msk.f32.vlgmr.msrb.gmra.mxu0 %vm378_vm5, %v567_v28 }
 0x9fd   :  { %v587_v32 = vpop.f32.mrf.mxu0 }
 0x9fe   :  { %v590_v33 = vadd.f32 %v587_v32, %v305_v30 }
 0xa00   :  { %v591_v31 = vmul.f32 %v590_v33, %v1048_v52 }
 0xa02   :  { %879 = vtanh.f32 %v591_v31 }
 0xa08   :  { %v880_v34 = vpop.eup %879 }
 0xa09   :  { %v593_v35 = vmul.f32 %v880_v34, %v1048_v52 }
 0xa0b   :  { %v594_v36 = vadd.f32 %v593_v35, %v1051_v57 }
 0xa0d   :  { %597 = vrot.lane.b32.xlu1 %v594_v36, %s949_s11  ;;  %v595_v39 = vmul.f32 %v594_v36, %v558_v23 }
 0xa7f   :  { %v598_v37 = vpop.permute.xlu1 %597 }
 0xa80   :  { %v600_v38 = vmul.f32 %v598_v37, %v594_v36  ;;  %v198_v37 = vperm.slane %v1043_v47, 7 }
 0xa82   :  { %602 = vrot.lane.b32.xlu2 %v600_v38, %s952_s2  ;;  %v365_v38 = vadd.f32 %v1122_v15, %v198_v37 }
 0xadc   :  { %v603_v44 = vpop.permute.xlu2 %602 }
 0xadd   :  { %v605_v45 = vadd.f32 %v603_v44, %v595_v39 }
 0xadf   :  { %881 = vtanh.f32 %v605_v45 }
 0xae5   :  { %v882_v48 = vpop.eup %881 }
 0xae6   :  { %608 = vrot.lane.b32.xlu0 %v882_v48, %s949_s11 }
 0xb58   :  { %v609_v2 = vpop.permute.xlu0 %608 }
 0xb59   :  { %v611_v3 = vmul.f32 %v609_v2, %v594_v36  ;;  %v798_v2 = vld [vmem:[%s1249_s6 + $0x58] sm:$0xff] }
 0xb5a   :  { %811 = vmatpush.msra.mxu1 %v798_v2 }
 0xb5b   :  { %613 = vrot.lane.b32.xlu1 %v611_v3, %s952_s2  ;;  %v797_v3 = vld [vmem:[%s1249_s6 + $0x50] sm:$0xff] }
 0xb5c   :  { %812 = vmatpush.msra.mxu1 %v797_v3 }
 0xb5e   :  { %813 = vmatpush.msra.mxu1 %v796_v4 }
 0xb60   :  { %814 = vmatpush.msra.mxu1 %v795_v5 }
 0xbcd   :  { %v614_v6 = vpop.permute.xlu1 %613 }
 0xbce   :  { %850 = vmatmul.msk.f32.vlgmr.msrb.gmra.mxu3 %vm378_vm5, %v614_v6  ;;  %v794_v6 = vld [vmem:[%s1249_s6 + $0x38] sm:$0xff] }
 0xbcf   :  { %815 = vmatpush.msra.mxu1 %v794_v6 }
 0xbd1   :  { %816 = vmatpush.msra.mxu1 %v793_v7 }
 0xbd3   :  { %817 = vmatpush.msra.mxu1 %v792_v8 }
 0xc51   :  { %v634_v10 = vpop.f32.mrf.mxu3 }
 0xc52   :  { %v637_v11 = vadd.f32 %v634_v10, %v325_v9  ;;  %v791_v9 = vld [vmem:[%s1249_s6 + $0x20] sm:$0xff]  ;;  %v790_v10 = vld [vmem:[%s1249_s6 + $0x18] sm:$0xff] }
 0xc53   :  { %818 = vmatpush.msra.mxu1 %v791_v9 }
 0xc54   :  { %v638_v12 = vmul.f32 %v637_v11, %v1048_v52 }
 0xc55   :  { %819 = vmatpush.msra.mxu1 %v790_v10 }
 0xc56   :  { %883 = vtanh.f32 %v638_v12  ;;  %v789_v12 = vld [vmem:[%s1249_s6 + $0x10] sm:$0xff] }
 0xc57   :  { %820 = vmatpush.msra.mxu1 %v789_v12 }
 0xc5c   :  { %v884_v13 = vpop.eup %883 }
 0xc5d   :  { %v640_v14 = vmul.f32 %v884_v13, %v1048_v52  ;;  %v788_v13 = vld [vmem:[%s1249_s6 + $0x8] sm:$0xff] }
 0xc5e   :  { %821 = vmatpush.msra.mxu1 %v788_v13 }
 0xc5f   :  { %v641_v16 = vadd.f32 %v640_v14, %v1051_v57  ;;  %v787_v14 = vld [vmem:[%s1249_s6] sm:$0xff] }
 0xc60   :  { %822 = vmatpush.msra.mxu1 %v787_v14 }
 0xc61   :  { %644 = vrot.lane.b32.xlu2 %v641_v16, %s949_s11  ;;  %v642_v18 = vmul.f32 %v641_v16, %v605_v45 }
 0xcbb   :  { %v645_v24 = vpop.permute.xlu2 %644 }
 0xcbc   :  { %v647_v17 = vmul.f32 %v645_v24, %v641_v16 }
 0xcbe   :  { %649 = vrot.lane.b32.xlu0 %v647_v17, %s952_s2 }
 0xd30   :  { %v650_v19 = vpop.permute.xlu0 %649 }
 0xd31   :  { %v652_v20 = vadd.f32 %v650_v19, %v642_v18  ;;  %v862_v19 = vld [vmem:[%s1250_s7] ss:$0 sm:$0xff] }
 0xd33   :  { %885 = vtanh.f32 %v652_v20 }
 0xd39   :  { %v886_v21 = vpop.eup %885 }
 0xd3a   :  { %655 = vrot.lane.b32.xlu1 %v886_v21, %s949_s11 }
 0xdac   :  { %v656_v40 = vpop.permute.xlu1 %655 }
 0xdad   :  { %v658_v41 = vmul.f32 %v656_v40, %v641_v16  ;;  %v861_v16 = vld [vmem:[%s1248_s5] ss:$0 sm:$0xff] }
 0xdaf   :  { %660 = vrot.lane.b32.xlu2 %v658_v41, %s952_s2 }
 0xe09   :  { %v661_v42 = vpop.permute.xlu2 %660 }
 0xe0a   :  { %851 = vmatmul.msk.f32.vlgmr.msra.gmra.mxu2 %vm378_vm5, %v661_v42 }
 0xe8d   :  { %v681_v0 = vpop.f32.mrf.mxu2 }
 0xe8e   :  { %v684_v23 = vadd.f32 %v681_v0, %v345_v22 }
 0xe90   :  { %v685_v25 = vmul.f32 %v684_v23, %v1048_v52 }
 0xe92   :  { %887 = vtanh.f32 %v685_v25 }
 0xe98   :  { %v888_v26 = vpop.eup %887 }
 0xe99   :  { %v687_v27 = vmul.f32 %v888_v26, %v1048_v52 }
 0xe9b   :  { %v688_v28 = vadd.f32 %v687_v27, %v1051_v57 }
 0xe9d   :  { %691 = vrot.lane.b32.xlu0 %v688_v28, %s949_s11  ;;  %v689_v32 = vmul.f32 %v688_v28, %v652_v20 }
 0xf0f   :  { %v692_v29 = vpop.permute.xlu0 %691 }
 0xf10   :  { %v694_v30 = vmul.f32 %v692_v29, %v688_v28 }
 0xf12   :  { %696 = vrot.lane.b32.xlu1 %v694_v30, %s952_s2 }
 0xf84   :  { %v697_v33 = vpop.permute.xlu1 %696 }
 0xf85   :  { %v699_v31 = vadd.f32 %v697_v33, %v689_v32 }
 0xf87   :  { %889 = vtanh.f32 %v699_v31 }
 0xf8d   :  { %v890_v63 = vpop.eup %889 }
 0xf8e   :  { %702 = vrot.lane.b32.xlu2 %v890_v63, %s949_s11 }
 0xfe8   :  { %v703_v34 = vpop.permute.xlu2 %702 }
 0xfe9   :  { %v705_v35 = vmul.f32 %v703_v34, %v688_v28 }
 0xfeb   :  { %707 = vrot.lane.b32.xlu0 %v705_v35, %s952_s2 }
0x105d   :  { %v708_v36 = vpop.permute.xlu0 %707 }
0x105e   :  { %852 = vmatmul.msk.f32.vlgmr.msra.gmra.mxu3 %vm378_vm5, %v708_v36 }
0x10e1   :  { %v728_v39 = vpop.f32.mrf.mxu3 }
0x10e2   :  { %v731_v44 = vadd.f32 %v728_v39, %v365_v38 }
0x10e4   :  { %v732_v45 = vmul.f32 %v731_v44, %v1048_v52 }
0x10e6   :  { %891 = vtanh.f32 %v732_v45 }
0x10ec   :  { %v892_v48 = vpop.eup %891 }
0x10ed   :  { %v734_v46 = vmul.f32 %v892_v48, %v1048_v52  ;;  %v755_v52 = vld [vmem:[%s1247_s4 + $0x10] sm:$0xff] }
0x10ee   :  { %779 = vmatpush.msra.mxu0 %v755_v52 }
0x10ef   :  { %v735_v49 = vadd.f32 %v734_v46, %v1051_v57  ;;  %v754_v57 = vld [vmem:[%s1247_s4 + $0x8] sm:$0xff] }
0x10f0   :  { %780 = vmatpush.msra.mxu0 %v754_v57 }
0x10f1   :  { %738 = vrot.lane.b32.xlu1 %v735_v49, %s949_s11  ;;  %v736_v53 = vmul.f32 %v735_v49, %v699_v31 }
0x10f2   :  { %781 = vmatpush.msra.mxu0 %v753_v56 }
0x1163   :  { %v739_v50 = vpop.permute.xlu1 %738 }
0x1164   :  { %v741_v51 = vmul.f32 %v739_v50, %v735_v49 }
0x1166   :  { %743 = vrot.lane.b32.xlu2 %v741_v51, %s952_s2 }
0x11c0   :  { %v744_v47 = vpop.permute.xlu2 %743 }
0x11c1   :  { %v746_v54 = vadd.f32 %v744_v47, %v736_v53 }
0x11c3   :  { %893 = vtanh.f32 %v746_v54 }
0x11c9   :  { %v894_v15 = vpop.eup %893 }
0x11ca   :  { %749 = vrot.lane.b32.xlu0 %v894_v15, %s949_s11 }
0x123c   :  { %v750_v58 = vpop.permute.xlu0 %749 }
0x123d   :  { %v752_v59 = vmul.f32 %v750_v58, %v735_v49 }
0x123f   :  { %762 = vrot.lane.b32.xlu1 %v752_v59, %s952_s2 }
0x12b1   :  { %v763_v11 = vpop.permute.xlu1 %762 }
0x12b2   :  { %853 = vmatmul.msk.f32.vlgmr.msra.gmra.mxu0 %vm378_vm5, %v763_v11 }
0x132f   :  { %v783_v24 = vpop.f32.mrf.mxu0 }
0x1330   :  { %v784_v17 = vadd.f32 %v861_v16, %v783_v24 }
0x1332   :  { %v786_v18 = vmax.f32 %v784_v17, 0.0 }
0x1334   :  { %823 = vmatmul.f32.vlgmr.msra.gmra.mxu1 %v786_v18 }
0x13b1   :  { %v824_v20 = vpop.f32.mrf.mxu1 }
0x13b2   :  { %v825_v21 = vadd.f32 %v862_v19, %v824_v20 }
0x13b4   :  { %828 = vst.msk [vmem:[#allocation5] sm:$0x3] %vm827_vm6, %v825_v21 }
0x13b5   :  { %839 = dma.vmem_to_hbm [thread:$0]  %s835_s14, 32, %s837_s17, [#allocation4]  }
0x13b6   :  { %945 = dma.done.wait [#allocation4], 32  }
0x13b7   :  { %946 = vsyncadd [#allocation4], 4294967264 }
0x13b8   :  { %844 = vsyncpa [#allocation3], 1 }
0x13b9   :  { %845 = vsyncpa [#allocation4], 1 }

</bundles_post_ra>
